<compile_context>
chip_gen: v5e
topology: v5e:2x2
jax: 0.10.0
libtpu: 0.0.40
codegen_flags: <defaults>
</compile_context>

<pallas_src>
import functools

import jax
import jax.numpy as jnp
from jax.experimental import pallas as pl
from jax.experimental.pallas import tpu as pltpu

_LANE = 128
_WEIGHT_VMEM_BUDGET = 4 * 1024 * 1024     # resident-weight budget before N-tiling
_TILE_VMEM_BUDGET = 40 * 1024 * 1024      # soft cap on per-step tile VMEM
_VMEM_FLOOR = 16 * 1024 * 1024            # never request below smallest default
_VMEM_CAP = 48 * 1024 * 1024              # leave headroom on v7x (64 MiB physical)


def _round_up(x, m):
    return ((x + m - 1) // m) * m


def _sublane(dtype):
    # Native sublane tile is 8 rows of 32-bit; packed dtypes need 16/32 rows.
    return 8 * (4 // jnp.dtype(dtype).itemsize)


def _residual_add_kernel(x_ref, w_ref, b_ref, o_ref, *, precision=None):
    """o = x @ W + b + x.  Residual added as an exact f32 VPU add (free: mem-bound)."""
    y = jnp.dot(x_ref[...], w_ref[...],
                preferred_element_type=jnp.float32, precision=precision)
    tn = o_ref.shape[-1]
    if x_ref.shape[-1] == tn:
        # Single N tile (resident weight): residual is the whole x block.
        res = x_ref[...]
    else:
        # N-tiled weight: residual is the matching column slab of x.
        j = pl.program_id(1)
        res = x_ref[:, pl.ds(pl.multiple_of(j * tn, tn), tn)]
    o_ref[...] = (y + b_ref[...] + res.astype(jnp.float32)).astype(o_ref.dtype)


def _prepare_params(w, b, dtype):
    """Pack W/b once (hoisted out of the per-call path)."""
    C = w.shape[0]
    item = jnp.dtype(dtype).itemsize
    if C < _LANE and _LANE % C == 0:
        # Lane-dense packing: p rows per lane-row; block-diagonal kron(I_p, W)
        # keeps the math exact and makes stores full-lane (no vst.msk).
        p = _LANE // C
        Cp = _LANE
        w_p = jnp.kron(jnp.eye(p, dtype=w.dtype), w)
        b_p = jnp.tile(b, p)
    else:
        # Pad channels up to a multiple of 128 (zero padding: exact, sliced off).
        p = 1
        Cp = _round_up(C, _LANE)
        w_p = jnp.pad(w, ((0, Cp - C), (0, Cp - C)))
        b_p = jnp.pad(b, (0, Cp - C))

    # N-tile the weight when a resident (Cp, Cp) block would blow the budget.
    tn = Cp
    if Cp * Cp * item > _WEIGHT_VMEM_BUDGET:
        q = Cp // _LANE
        d = max((dd for dd in range(1, q + 1)
                 if q % dd == 0 and _LANE * dd * Cp * item <= _WEIGHT_VMEM_BUDGET),
                default=1)
        tn = _LANE * d

    w_p = jnp.asarray(w_p, dtype)
    b_p = jnp.asarray(b_p, jnp.float32).reshape(1, Cp)
    return w_p, b_p, p, Cp, tn


def residual_add_2d(x2d, w_p, b_p, p, Cp, tn, *, tile_m=1024, precision=None):
    """fn(x) + x for a channels-last (M, C) slab, using pre-packed params."""
    M, C = x2d.shape
    dtype = x2d.dtype
    item = jnp.dtype(dtype).itemsize

    # --- pack / pad the activation into a lane-dense (M2, Cp) slab -----------
    Mp = _round_up(M, p)
    Cin = Cp // p                       # == C when packed, padded width when p == 1
    pads = ((0, Mp - M), (0, Cin - C))
    if pads != ((0, 0), (0, 0)):
        x2d = jnp.pad(x2d, pads)
    xp = x2d.reshape(Mp // p, Cp)
    M2 = xp.shape[0]

    # --- row tile choice ------------------------------------------------------
    sub = _sublane(dtype)
    tm = min(_round_up(tile_m, sub), _round_up(M2, sub))
    # Give v7x's two TensorCores at least 2 grid steps when there's enough data.
    if tm >= M2 and M2 > sub:
        tm = _round_up(pl.cdiv(M2, 2), sub)
    tm = max(tm, sub)
    # Shrink the row tile if a very wide Cp would blow the VMEM tile budget.
    while tm > sub and ((2 * tm * Cp + 2 * tm * tn + 2 * Cp * tn) * item
                        + 2 * tn * 4) > _TILE_VMEM_BUDGET:
        tm = max(sub, _round_up(tm // 2, sub))

    M2p = _round_up(M2, tm)
    if M2p != M2:
        xp = jnp.pad(xp, ((0, M2p - M2), (0, 0)))
    grid_m = M2p // tm
    grid_n = Cp // tn

    # --- VMEM budget ----------------------------------------------------------
    need = (2 * tm * Cp + 2 * tm * tn + 2 * Cp * tn) * item + 2 * tn * 4
    cap = _VMEM_CAP
    try:
        cap = min(cap, int(0.75 * pltpu.get_tpu_info().vmem_capacity_bytes))
    except Exception:
        pass
    vmem_limit = int(min(cap, max(2 * need, _VMEM_FLOOR)))

    # --- specs ----------------------------------------------------------------
    # Resident weight/bias (constant index_map) get single buffering when big
    # enough to matter; the tiny test-sized weight keeps the default path.
    item_w = jnp.dtype(w_p.dtype).itemsize
    use_single_buf = (grid_n == 1 and hasattr(pl, "Buffered")
                      and Cp * tn * item_w > (1 << 20))
    if use_single_buf:
        w_spec = pl.BlockSpec((Cp, tn), lambda i, j: (0, j),
                              pipeline_mode=pl.Buffered(1))
        b_spec = pl.BlockSpec((1, tn), lambda i, j: (0, j),
                              pipeline_mode=pl.Buffered(1))
    else:
        w_spec = pl.BlockSpec((Cp, tn), lambda i, j: (0, j))
        b_spec = pl.BlockSpec((1, tn), lambda i, j: (0, j))

    cost = pl.CostEstimate(
        flops=2 * M2p * Cp * Cp,
        transcendentals=0,
        bytes_accessed=2 * M2p * Cp * item + Cp * Cp * item_w + Cp * 4,
    )

    out = pl.pallas_call(
        functools.partial(_residual_add_kernel, precision=precision),
        out_shape=jax.ShapeDtypeStruct((M2p, Cp), dtype),
        grid_spec=pltpu.PrefetchScalarGridSpec(
            num_scalar_prefetch=0,
            grid=(grid_m, grid_n),
            in_specs=[
                pl.BlockSpec((tm, Cp), lambda i, j: (i, 0)),  # activation tile
                w_spec,                                       # weight (resident / N-tiled)
                b_spec,                                       # bias
            ],
            out_specs=pl.BlockSpec((tm, tn), lambda i, j: (i, j)),
        ),
        compiler_params=pltpu.CompilerParams(
            dimension_semantics=("parallel", "arbitrary"),  # M sharded on v7x
            vmem_limit_bytes=vmem_limit,
        ),
        cost_estimate=cost,
    )(xp, w_p, b_p)

    # --- unpack / unpad back to (M, C) ---------------------------------------
    out = out[:M2]
    if p > 1:
        out = out.reshape(M2 * p, Cin)[:M]
    elif Cp != C:
        out = out[:, :C]
    return out


class ResidualAddPallas:
    """ResidualAdd(fn) with fn(x) = x @ W + b (1x1-conv style channel projection).

    Weight/bias packing is precomputed once at construction; the NCHW apply is
    jitted so the layout transposes / pads / pack-reshape fuse into a single
    relayout copy around the Pallas kernel.
    """

    def __init__(self, w, b, dtype=jnp.float32, tile_m=1024, precision=None):
        self.C = int(w.shape[0])
        self.tile_m = tile_m
        self.precision = precision
        self.w_p, self.b_p, self.p, self.Cp, self.tn = _prepare_params(w, b, dtype)
        self.apply_2d = jax.jit(self._apply_2d_impl)      # channels-last fast path
        self._apply_nchw = jax.jit(self._apply_nchw_impl)  # PyTorch-parity path

    def _apply_2d_impl(self, x2d):
        return residual_add_2d(x2d, self.w_p, self.b_p, self.p, self.Cp, self.tn,
                               tile_m=self.tile_m, precision=self.precision)

    def _apply_nchw_impl(self, x):
        B, C, H, W = x.shape
        x2d = jnp.transpose(x, (0, 2, 3, 1)).reshape(B * H * W, C)
        out2d = self._apply_2d_impl(x2d)
        return jnp.transpose(out2d.reshape(B, H, W, C), (0, 3, 1, 2))

    def __call__(self, x):
        return self._apply_nchw(x)


if __name__ == "__main__":
    key = jax.random.PRNGKey(0)
    kx, kw, kb = jax.random.split(key, 3)

    B, C, H, W = 2, 4, 16, 16
    x = jax.random.normal(kx, (B, C, H, W), dtype=jnp.float32)
    # deterministic "fn" parameters (1x1 conv / channel linear)
    w = jax.random.normal(kw, (C, C), dtype=jnp.float32) * 0.1
    b = jax.random.normal(kb, (C,), dtype=jnp.float32) * 0.1

    mod = ResidualAddPallas(w, b, dtype=x.dtype)
    out = jax.block_until_ready(mod(x))

    # pure-JAX reference of ResidualAdd(fn)(x) = fn(x) + x
    x2d = jnp.transpose(x, (0, 2, 3, 1)).reshape(-1, C)
    ref2d = x2d @ w + b + x2d
    ref = jnp.transpose(ref2d.reshape(B, H, W, C), (0, 3, 1, 2))

    assert out.shape == x.shape and out.dtype == x.dtype
    assert jnp.allclose(out, ref, atol=1e-5, rtol=1e-5)
    print("KERNEL_OK")
</pallas_src>

<mosaic_0001>
module attributes {stable_mosaic.version = 11 : i64} {
  func.func @_residual_add_kernel(%arg0: i32, %arg1: i32, %arg2: memref<8x128xf32, #tpu.memory_space<vmem>>, %arg3: memref<128x128xf32, #tpu.memory_space<vmem>>, %arg4: memref<1x128xf32, #tpu.memory_space<vmem>>, %arg5: memref<8x128xf32, #tpu.memory_space<vmem>>) attributes {dimension_semantics = [#tpu.dimension_semantics<parallel>, #tpu.dimension_semantics<arbitrary>], iteration_bounds = array<i64: 2, 1>, scalar_prefetch = 0 : i64, scratch_operands = 0 : i64, tpu.core_type = #tpu.core_type<tc>, window_params = [{transform_indices = @transform_0, window_bounds = array<i64: 8, 128>}, {transform_indices = @transform_1, window_bounds = array<i64: 128, 128>}, {transform_indices = @transform_2, window_bounds = array<i64: 1, 128>}, {transform_indices = @transform_3, window_bounds = array<i64: 8, 128>}]} {
    %c0 = arith.constant 0 : index
    %c0_0 = arith.constant 0 : index
    %0 = vector.load %arg2[%c0, %c0_0] : memref<8x128xf32, #tpu.memory_space<vmem>>, vector<8x128xf32>
    %c0_1 = arith.constant 0 : index
    %c0_2 = arith.constant 0 : index
    %1 = vector.load %arg3[%c0_1, %c0_2] : memref<128x128xf32, #tpu.memory_space<vmem>>, vector<128x128xf32>
    %cst = arith.constant dense<0.000000e+00> : vector<8x128xf32>
    %2 = tpu.matmul %0, %1, %cst {dimension_numbers = #tpu.dot_dimension_numbers<[1], [0], [0], [1], [0, 0, 1, 1], [], []>} : vector<8x128xf32>, vector<128x128xf32>, vector<8x128xf32> -> vector<8x128xf32>
    %c0_3 = arith.constant 0 : index
    %c0_4 = arith.constant 0 : index
    %3 = vector.load %arg2[%c0_3, %c0_4] : memref<8x128xf32, #tpu.memory_space<vmem>>, vector<8x128xf32>
    %c0_5 = arith.constant 0 : index
    %c0_6 = arith.constant 0 : index
    %4 = vector.load %arg4[%c0_5, %c0_6] : memref<1x128xf32, #tpu.memory_space<vmem>>, vector<1x128xf32>
    %5 = vector.broadcast %4 : vector<1x128xf32> to vector<8x128xf32>
    %6 = arith.addf %2, %5 : vector<8x128xf32>
    %7 = arith.addf %6, %3 : vector<8x128xf32>
    %c0_7 = arith.constant 0 : index
    %c0_8 = arith.constant 0 : index
    %8 = vector.load %arg5[%c0_7, %c0_8] : memref<8x128xf32, #tpu.memory_space<vmem>>, vector<8x128xf32>
    tpu.vector_store %arg5[%c0_7, %c0_8], %7 {strides = array<i32>} : memref<8x128xf32, #tpu.memory_space<vmem>>, vector<8x128xf32>,
    return
  }
  func.func @transform_0(%arg0: i32, %arg1: i32) -> (i32, i32) {
    %c0_i32 = arith.constant 0 : i32
    %c0_i32_0 = arith.constant 0 : i32
    return %arg0, %c0_i32 : i32, i32
  }
  func.func @transform_1(%arg0: i32, %arg1: i32) -> (i32, i32) {
    %c0_i32 = arith.constant 0 : i32
    %c0_i32_0 = arith.constant 0 : i32
    return %c0_i32, %arg1 : i32, i32
  }
  func.func @transform_2(%arg0: i32, %arg1: i32) -> (i32, i32) {
    %c0_i32 = arith.constant 0 : i32
    %c0_i32_0 = arith.constant 0 : i32
    return %c0_i32, %arg1 : i32, i32
  }
  func.func @transform_3(%arg0: i32, %arg1: i32) -> (i32, i32) {
    %c0_i32 = arith.constant 0 : i32
    return %arg0, %arg1 : i32, i32
  }
}

</mosaic_0001>

<bundles_post_ra>
// kernel: _apply_nchw_impl.1
= control target key start
LH: loop header
LB: loop body
LE: loop exit
PB: predicated region body
PF: predicated region fallthrough
CT: control target
= control target key end

     0   :  { %s439_s12 = smov 0   ;;  %s441_s13 = smov 0   ;;  %s527_s0 = inlined_call_operand.vmem [shape: f32[16,128], index: 0, kind: input, shape index: {}]   ;;  %s528_s1 = inlined_call_operand.vmem [shape: f32[128,128], index: 1, kind: input, shape index: {}]   ;;  %s529_s2 = inlined_call_operand.vmem [shape: f32[1,128], index: 2, kind: input, shape index: {}]   ;;  %s530_s3 = inlined_call_operand.vmem [shape: f32[16,128], index: 3, kind: output, shape index: {}]  }
   0x1   :  { %s443_s14 = smov 0  }
   0x2 LB: > { %s25_s15 = sadd.s32 1, %s413_s13  ;;  %p365_p0 = scmp.ge.s32.totalorder %s417_s14, 1  ;;  %s417_s14 = sphi %s443_s14, %s13_s14   ;;  %s413_s13 = sphi %s441_s13, %s532_s13   ;;  %s409_s12 = sphi %s439_s12, %s531_s12  }
   0x3   : > { %p27_p1 = scmp.ge.s32.totalorder %s25_s15, 2  ;;  %p167_p2 = scmp.lt.s32.totalorder %s417_s14, 3 }
   0x5   : > { %s534_s15 = smov (%p27_p1, %s25_s15), 0  ;;  %p168_p3 = pnand %p365_p0, %p167_p2 }
   0x6   : > { %p199_p4 = scmp.lt.s32.totalorder (!%p168_p3), %s409_s12, 1 }
   0x7   : > { %171 = sbr.rel (%p168_p3) target bundleno = 175 (0xaf), region = 32 }
   0xc   : > { %v233_v0 = vld [vmem:[%s528_s1 + $0x78] sm:$0xff]  ;;  %v232_v1 = vld [vmem:[%s528_s1 + $0x70] sm:$0xff]  ;;  %v231_v2 = vld [vmem:[%s528_s1 + $0x68] sm:$0xff]  ;;  %s536_s12 = smov (!%p199_p4, %s409_s12), 1 }
   0xd   : > { %238 = vmatpush.msra.mxu0 %v233_v0  ;;  %v230_v3 = vld [vmem:[%s528_s1 + $0x60] sm:$0xff]  ;;  %v229_v4 = vld [vmem:[%s528_s1 + $0x58] sm:$0xff]  ;;  %v228_v5 = vld [vmem:[%s528_s1 + $0x50] sm:$0xff]  ;;  %s366_s19 = sshll.u32 %s536_s12, 3 }
   0xe   : > { %v227_v6 = vld [vmem:[%s528_s1 + $0x48] sm:$0xff]  ;;  %v226_v7 = vld [vmem:[%s528_s1 + $0x40] sm:$0xff]  ;;  %v225_v8 = vld [vmem:[%s528_s1 + $0x38] sm:$0xff]  ;;  %s202_s26 = scalar_lea.vmem %s527_s0, %s366_s19  ;;  %s216_s5 = scalar_lea.vmem %s530_s3, %s366_s19 }
   0xf   : > { %239 = vmatpush.msra.mxu0 %v232_v1  ;;  %v224_v9 = vld [vmem:[%s528_s1 + $0x30] sm:$0xff]  ;;  %v223_v10 = vld [vmem:[%s528_s1 + $0x28] sm:$0xff]  ;;  %v222_v11 = vld [vmem:[%s528_s1 + $0x20] sm:$0xff] }
  0x10   : > { %v221_v12 = vld [vmem:[%s528_s1 + $0x18] sm:$0xff]  ;;  %v220_v13 = vld [vmem:[%s528_s1 + $0x10] sm:$0xff]  ;;  %v219_v14 = vld [vmem:[%s528_s1 + $0x8] sm:$0xff] }
  0x11   : > { %240 = vmatpush.msra.mxu0 %v231_v2  ;;  %v218_v15 = vld [vmem:[%s528_s1] sm:$0xff] }
  0x12   : > { %v217_v16 = vld [vmem:[%s202_s26] sm:$0xff] }
  0x13   : > { %241 = vmatpush.msra.mxu0 %v230_v3  ;;  %v394_v17 = vld [vmem:[%s529_s2] ss:$0 sm:$0xff] }
  0x15   : > { %242 = vmatpush.msra.mxu0 %v229_v4 }
  0x17   : > { %243 = vmatpush.msra.mxu0 %v228_v5 }
  0x19   : > { %244 = vmatpush.msra.mxu0 %v227_v6 }
  0x1b   : > { %245 = vmatpush.msra.mxu0 %v226_v7 }
  0x1d   : > { %246 = vmatpush.msra.mxu0 %v225_v8 }
  0x1f   : > { %247 = vmatpush.msra.mxu0 %v224_v9 }
  0x21   : > { %248 = vmatpush.msra.mxu0 %v223_v10 }
  0x23   : > { %249 = vmatpush.msra.mxu0 %v222_v11 }
  0x25   : > { %250 = vmatpush.msra.mxu0 %v221_v12 }
  0x27   : > { %251 = vmatpush.msra.mxu0 %v220_v13 }
  0x29   : > { %252 = vmatpush.msra.mxu0 %v219_v14 }
  0x2b   : > { %253 = vmatpush.msra.mxu0 %v218_v15 }
  0x2c   : > { %254 = vmatmul.f32.vlgmr.msra.gmra.mxu0 %v217_v16 }
  0xa9   : > { %v255_v18 = vpop.f32.mrf.mxu0 }
  0xaa   : > { %v256_v19 = vadd.f32 %v394_v17, %v255_v18 }
  0xac   : > { %v258_v20 = vadd.f32 %v256_v19, %v217_v16 }
  0xae   : > { %259 = vst [vmem:[%s216_s5] sm:$0xff] %v258_v20 }
  0xaf PF: > { %s13_s14 = sadd.s32 1, %s417_s14   ;;  %s531_s12 = smov %s413_s13 }
  0xb0   : > { %p10_p5 = scmp.ge.s32.totalorder %s13_s14, 4   ;;  %s532_s13 = smov %s534_s15 }
  0xb2   :  { %12 = sbr.rel (!%p10_p5) target bundleno = 2 (0x2), region = 68 }

</bundles_post_ra>
